<compile_context>
chip_gen: v7x
topology: tpu7x:2x2x1
jax: 0.10.0
libtpu: 0.0.40
codegen_flags: <defaults>
</compile_context>

<pallas_src>
import functools

import jax
import jax.numpy as jnp
from jax.experimental import pallas as pl
from jax.experimental.pallas import tpu as pltpu

TEMPERATURE = 0.07
_EPS = 1e-12  # matches torch F.normalize default eps


def _infonce_kernel(a_ref, p_ref, n_ref, out_ref, *, batch, tile,
                    tiles_per_slice, inv_temperature):
    s = pl.program_id(0)          # slice index (parallel axis, per-TC on v7x)
    i = pl.program_id(1)          # tile index within the slice (reduction)
    tile_idx = s * tiles_per_slice + i

    a = a_ref[...].astype(jnp.float32)
    p = p_ref[...].astype(jnp.float32)
    n = n_ref[...].astype(jnp.float32)

    # Per-row reductions (lane-axis sums); no full-width normalized
    # temporaries are materialized.
    ss_a = jnp.sum(a * a, axis=1, keepdims=True)     # (TB, 1)
    ss_p = jnp.sum(p * p, axis=1, keepdims=True)
    ss_n = jnp.sum(n * n, axis=1, keepdims=True)
    dot_ap = jnp.sum(a * p, axis=1, keepdims=True)
    dot_an = jnp.sum(a * n, axis=1, keepdims=True)

    # F.normalize semantics: x / max(||x||, eps) (clamp the norm, not norm^2).
    norm_a = jnp.maximum(jnp.sqrt(ss_a), _EPS)
    norm_p = jnp.maximum(jnp.sqrt(ss_p), _EPS)
    norm_n = jnp.maximum(jnp.sqrt(ss_n), _EPS)

    pos = dot_ap / (norm_a * norm_p)                 # (TB, 1) cosine sims
    neg = dot_an / (norm_a * norm_n)

    # CE with label 0 over [pos, neg]/T == stable softplus of the logit gap.
    d = (neg - pos) * jnp.float32(inv_temperature)
    per_example = jnp.maximum(d, 0.0) + jnp.log1p(jnp.exp(-jnp.abs(d)))

    # Mask rows past the true batch (ragged last tile and any overflow grid
    # points whose tile_idx >= num_tiles; their loaded data is unspecified
    # but jnp.where keeps NaN/Inf from propagating).
    row = tile_idx * tile + jax.lax.broadcasted_iota(
        jnp.int32, per_example.shape, 0)
    per_example = jnp.where(row < batch, per_example, 0.0)
    partial = jnp.sum(per_example)                   # scalar

    # Per-slice accumulator = this slice's (1, 8, 128) output block, resident
    # in VMEM across the inner ("arbitrary") axis.
    @pl.when(i == 0)
    def _():
        out_ref[...] = jnp.zeros_like(out_ref)

    r = jax.lax.broadcasted_iota(jnp.int32, out_ref.shape, 1)
    c = jax.lax.broadcasted_iota(jnp.int32, out_ref.shape, 2)
    out_ref[...] += jnp.where((r == 0) & (c == 0), partial, 0.0)


def _vmem_capacity_bytes():
    try:
        return int(pltpu.get_tpu_info().vmem_capacity_bytes)
    except Exception:
        return 64 * 1024 * 1024  # conservative (v7x-sized) fallback


def _choose_tile(batch, feat, sublane, vmem_cap):
    """Largest batch tile whose f32 working set fits the per-buffer budget."""
    # Budget per input per pipeline buffer, measured on the f32 working set
    # (inputs are cast to f32 in-kernel), ~VMEM/24:
    #   v5e/v6e (128 MiB): ~5.3 MiB/buffer -> ~32 MiB of pipeline buffers
    #   v7x     ( 64 MiB): ~2.7 MiB/buffer -> ~16 MiB of pipeline buffers
    # leaving ample headroom for temporaries under vmem_limit_bytes below.
    # Cap on bytes, not rows.
    per_buffer_f32 = vmem_cap // 24
    tb = max(sublane, per_buffer_f32 // max(1, feat * 4))
    tb = max(sublane, (tb // sublane) * sublane)
    # Avoid degenerate 1-2 step grids: aim for >= 4 tiles when batch allows,
    # so DMA overlaps compute/writeback even for mid-sized batches.
    steps_target = max(sublane, pl.cdiv(pl.cdiv(batch, 4), sublane) * sublane)
    return max(sublane, min(tb, steps_target))


def infonce_loss(anchor, positive, negative, temperature=TEMPERATURE,
                 tile=None, num_slices=None):
    assert anchor.shape == positive.shape == negative.shape
    assert anchor.ndim == 2
    B, D = anchor.shape
    itemsize = jnp.dtype(anchor.dtype).itemsize
    sublane = {4: 8, 2: 16, 1: 32}.get(itemsize, 8)
    vmem_cap = _vmem_capacity_bytes()

    if tile is None:
        tb = _choose_tile(B, D, sublane, vmem_cap)
    else:
        tb = max(sublane, (int(tile) // sublane) * sublane)

    num_tiles = pl.cdiv(B, tb)
    if num_slices is None:
        num_slices = 2 if num_tiles >= 2 else 1      # one slice per TC on v7x
    num_slices = max(1, min(int(num_slices), num_tiles))
    tiles_per_slice = pl.cdiv(num_tiles, num_slices)
    grid = (num_slices, tiles_per_slice)

    if num_slices * tiles_per_slice == num_tiles:
        def in_map(s, i):
            return (s * tiles_per_slice + i, 0)
    else:
        # Overflow grid points re-read the last valid tile (clamped index);
        # their contribution is fully masked out in-kernel.
        def in_map(s, i):
            return (jnp.minimum(s * tiles_per_slice + i, num_tiles - 1), 0)

    kernel = functools.partial(
        _infonce_kernel, batch=B, tile=tb, tiles_per_slice=tiles_per_slice,
        inv_temperature=1.0 / float(temperature))

    cost = pl.CostEstimate(
        flops=10 * B * D,                       # 5 mults + 5 reduce-adds / elt
        transcendentals=5 * B,                  # 3 sqrt + exp + log1p per row
        bytes_accessed=3 * B * D * itemsize + num_slices * 8 * 128 * 4,
    )

    # Explicit scoped-VMEM limit so the larger tiles fit on every generation
    # (physical: 128 MiB on v5e/v6e, 64 MiB per TC on v7x).
    vmem_limit = int(max(32 * 2**20, min(vmem_cap - 16 * 2**20, 100 * 2**20)))

    partials = pl.pallas_call(
        kernel,
        out_shape=jax.ShapeDtypeStruct((num_slices, 8, 128), jnp.float32),
        grid=grid,
        in_specs=[pl.BlockSpec((tb, D), in_map) for _ in range(3)],
        out_specs=pl.BlockSpec((1, 8, 128), lambda s, i: (s, 0, 0)),
        compiler_params=pltpu.CompilerParams(
            dimension_semantics=("parallel", "arbitrary"),
            vmem_limit_bytes=vmem_limit),
        cost_estimate=cost,
    )(anchor, positive, negative)

    # Tiny final reduction over num_slices * 1024 floats (only [s, 0, 0] are
    # nonzero) and the mean over the true batch size.
    return jnp.sum(partials) * jnp.float32(1.0 / B)


def _reference_loss(anchor, positive, negative, temperature=TEMPERATURE):
    a = anchor.astype(jnp.float32)
    p = positive.astype(jnp.float32)
    n = negative.astype(jnp.float32)

    def l2n(x):
        return x / jnp.maximum(jnp.linalg.norm(x, axis=1, keepdims=True), _EPS)

    a, p, n = l2n(a), l2n(p), l2n(n)
    pos = jnp.sum(a * p, axis=1, keepdims=True)
    neg = jnp.sum(a * n, axis=1, keepdims=True)
    logits = jnp.concatenate([pos, neg], axis=1) / temperature
    logprobs = jax.nn.log_softmax(logits, axis=1)
    return jnp.mean(-logprobs[:, 0])


if __name__ == "__main__":
    key = jax.random.PRNGKey(0)
    ks = jax.random.split(key, 12)

    # Case 1: small shape consistent with the module (B=8, D=32), single tile.
    B, D = 8, 32
    anchor = jax.random.normal(ks[0], (B, D), dtype=jnp.float32)
    positive = jax.random.normal(ks[1], (B, D), dtype=jnp.float32)
    negative = jax.random.normal(ks[2], (B, D), dtype=jnp.float32)
    loss = infonce_loss(anchor, positive, negative)
    jax.block_until_ready(loss)
    ref = _reference_loss(anchor, positive, negative)
    assert jnp.allclose(loss, ref, atol=1e-5, rtol=1e-5), (loss, ref)

    # Case 2: non-divisible batch + forced small tile -> exercises the 2-D
    # grid (parallel slices x tiles), the clamped overflow grid point, the
    # ragged (unpadded) last tile, and the per-slice accumulator init.
    B2, D2 = 20, 128
    a2 = jax.random.normal(ks[3], (B2, D2), dtype=jnp.float32)
    p2 = jax.random.normal(ks[4], (B2, D2), dtype=jnp.float32)
    n2 = jax.random.normal(ks[5], (B2, D2), dtype=jnp.float32)
    loss2 = infonce_loss(a2, p2, n2, tile=8)
    jax.block_until_ready(loss2)
    ref2 = _reference_loss(a2, p2, n2)
    assert jnp.allclose(loss2, ref2, atol=1e-5, rtol=1e-5), (loss2, ref2)

    # Case 3: default auto-tiling on a mid-size ragged batch.
    B3, D3 = 300, 256
    a3 = jax.random.normal(ks[6], (B3, D3), dtype=jnp.float32)
    p3 = jax.random.normal(ks[7], (B3, D3), dtype=jnp.float32)
    n3 = jax.random.normal(ks[8], (B3, D3), dtype=jnp.float32)
    loss3 = infonce_loss(a3, p3, n3)
    jax.block_until_ready(loss3)
    ref3 = _reference_loss(a3, p3, n3)
    assert jnp.allclose(loss3, ref3, atol=1e-5, rtol=1e-5), (loss3, ref3)

    # Case 4: bf16 inputs pass straight through (kernel casts tiles to f32).
    B4, D4 = 64, 128
    a4 = jax.random.normal(ks[9], (B4, D4), dtype=jnp.bfloat16)
    p4 = jax.random.normal(ks[10], (B4, D4), dtype=jnp.bfloat16)
    n4 = jax.random.normal(ks[11], (B4, D4), dtype=jnp.bfloat16)
    loss4 = infonce_loss(a4, p4, n4, tile=16)
    jax.block_until_ready(loss4)
    ref4 = _reference_loss(a4, p4, n4)
    assert jnp.allclose(loss4, ref4, atol=1e-5, rtol=1e-5), (loss4, ref4)

    print("KERNEL_OK")
</pallas_src>

<mosaic_0001>
module attributes {stable_mosaic.version = 11 : i64} {
  func.func @_infonce_kernel(%arg0: i32, %arg1: i32, %arg2: memref<8x32xf32, #tpu.memory_space<vmem>>, %arg3: memref<8x32xf32, #tpu.memory_space<vmem>>, %arg4: memref<8x32xf32, #tpu.memory_space<vmem>>, %arg5: memref<1x8x128xf32, #tpu.memory_space<vmem>>) attributes {dimension_semantics = [#tpu.dimension_semantics<parallel>, #tpu.dimension_semantics<arbitrary>], iteration_bounds = array<i64: 1, 1>, scalar_prefetch = 0 : i64, scratch_operands = 0 : i64, tpu.core_type = #tpu.core_type<tc>, window_params = [{transform_indices = @transform_0, window_bounds = array<i64: 8, 32>}, {transform_indices = @transform_1, window_bounds = array<i64: 8, 32>}, {transform_indices = @transform_2, window_bounds = array<i64: 8, 32>}, {transform_indices = @transform_3, window_bounds = array<i64: 1, 8, 128>}]} {
    %c1_i32 = arith.constant 1 : i32
    %0 = arith.muli %arg0, %c1_i32 : i32
    %1 = arith.addi %0, %arg1 : i32
    %c0 = arith.constant 0 : index
    %c0_0 = arith.constant 0 : index
    %2 = vector.load %arg2[%c0, %c0_0] : memref<8x32xf32, #tpu.memory_space<vmem>>, vector<8x32xf32>
    %c0_1 = arith.constant 0 : index
    %c0_2 = arith.constant 0 : index
    %3 = vector.load %arg3[%c0_1, %c0_2] : memref<8x32xf32, #tpu.memory_space<vmem>>, vector<8x32xf32>
    %c0_3 = arith.constant 0 : index
    %c0_4 = arith.constant 0 : index
    %4 = vector.load %arg4[%c0_3, %c0_4] : memref<8x32xf32, #tpu.memory_space<vmem>>, vector<8x32xf32>
    %5 = arith.mulf %2, %2 : vector<8x32xf32>
    %cst = arith.constant dense<0.000000e+00> : vector<8xf32>
    %6 = vector.multi_reduction <add>, %5, %cst [1] : vector<8x32xf32> to vector<8xf32>
    %7 = vector.shape_cast %6 : vector<8xf32> to vector<8x1xf32>
    %8 = arith.mulf %3, %3 : vector<8x32xf32>
    %cst_5 = arith.constant dense<0.000000e+00> : vector<8xf32>
    %9 = vector.multi_reduction <add>, %8, %cst_5 [1] : vector<8x32xf32> to vector<8xf32>
    %10 = vector.shape_cast %9 : vector<8xf32> to vector<8x1xf32>
    %11 = arith.mulf %4, %4 : vector<8x32xf32>
    %cst_6 = arith.constant dense<0.000000e+00> : vector<8xf32>
    %12 = vector.multi_reduction <add>, %11, %cst_6 [1] : vector<8x32xf32> to vector<8xf32>
    %13 = vector.shape_cast %12 : vector<8xf32> to vector<8x1xf32>
    %14 = arith.mulf %2, %3 : vector<8x32xf32>
    %cst_7 = arith.constant dense<0.000000e+00> : vector<8xf32>
    %15 = vector.multi_reduction <add>, %14, %cst_7 [1] : vector<8x32xf32> to vector<8xf32>
    %16 = vector.shape_cast %15 : vector<8xf32> to vector<8x1xf32>
    %17 = arith.mulf %2, %4 : vector<8x32xf32>
    %cst_8 = arith.constant dense<0.000000e+00> : vector<8xf32>
    %18 = vector.multi_reduction <add>, %17, %cst_8 [1] : vector<8x32xf32> to vector<8xf32>
    %19 = vector.shape_cast %18 : vector<8xf32> to vector<8x1xf32>
    %20 = math.sqrt %7 : vector<8x1xf32>
    %cst_9 = arith.constant 9.99999996E-13 : f32
    %21 = vector.broadcast %cst_9 : f32 to vector<8x1xf32>
    %22 = arith.maximumf %20, %21 : vector<8x1xf32>
    %23 = math.sqrt %10 : vector<8x1xf32>
    %cst_10 = arith.constant 9.99999996E-13 : f32
    %24 = vector.broadcast %cst_10 : f32 to vector<8x1xf32>
    %25 = arith.maximumf %23, %24 : vector<8x1xf32>
    %26 = math.sqrt %13 : vector<8x1xf32>
    %cst_11 = arith.constant 9.99999996E-13 : f32
    %27 = vector.broadcast %cst_11 : f32 to vector<8x1xf32>
    %28 = arith.maximumf %26, %27 : vector<8x1xf32>
    %29 = arith.mulf %22, %25 : vector<8x1xf32>
    %30 = arith.divf %16, %29 : vector<8x1xf32>
    %31 = arith.mulf %22, %28 : vector<8x1xf32>
    %32 = arith.divf %19, %31 : vector<8x1xf32>
    %33 = arith.subf %32, %30 : vector<8x1xf32>
    %cst_12 = arith.constant 14.2857141 : f32
    %34 = vector.broadcast %cst_12 : f32 to vector<8x1xf32>
    %35 = arith.mulf %33, %34 : vector<8x1xf32>
    %cst_13 = arith.constant 0.000000e+00 : f32
    %36 = vector.broadcast %cst_13 : f32 to vector<8x1xf32>
    %37 = arith.maximumf %35, %36 : vector<8x1xf32>
    %38 = math.absf %35 : vector<8x1xf32>
    %cst_14 = arith.constant 0.000000e+00 : f32
    %39 = vector.broadcast %cst_14 : f32 to vector<8x1xf32>
    %40 = arith.subf %39, %38 : vector<8x1xf32>
    %41 = math.exp %40 : vector<8x1xf32>
    %42 = math.log1p %41 : vector<8x1xf32>
    %43 = arith.addf %37, %42 : vector<8x1xf32>
    %c8_i32 = arith.constant 8 : i32
    %44 = arith.muli %1, %c8_i32 : i32
    %45 = tpu.iota {dimensions = array<i32: 0>} : vector<8x1xi32>
    %46 = vector.broadcast %44 : i32 to vector<8x1xi32>
    %47 = arith.addi %46, %45 : vector<8x1xi32>
    %c8_i32_15 = arith.constant 8 : i32
    %48 = vector.broadcast %c8_i32_15 : i32 to vector<8x1xi32>
    %49 = arith.cmpi slt, %47, %48 : vector<8x1xi32>
    %cst_16 = arith.constant 0.000000e+00 : f32
    %50 = vector.broadcast %cst_16 : f32 to vector<8x1xf32>
    %51 = arith.select %49, %43, %50 : vector<8x1xi1>, vector<8x1xf32>
    %52 = vector.shape_cast %51 : vector<8x1xf32> to vector<1x8x1xf32>
    %cst_17 = arith.constant dense<0.000000e+00> : vector<1xf32>
    %53 = vector.multi_reduction <add>, %52, %cst_17 [1, 2] : vector<1x8x1xf32> to vector<1xf32>
    %54 = vector.shape_cast %53 : vector<1xf32> to vector<1x1x1xf32>
    %55 = vector.extract %54[0, 0, 0] : f32 from vector<1x1x1xf32>
    %c0_i32 = arith.constant 0 : i32
    %56 = arith.cmpi eq, %arg1, %c0_i32 : i32
    %57 = arith.extui %56 : i1 to i32
    %c0_i32_18 = arith.constant 0 : i32
    %58 = arith.cmpi ne, %57, %c0_i32_18 : i32
    scf.if %58 {
      %cst_28 = arith.constant 0.000000e+00 : f32
      %72 = vector.broadcast %cst_28 : f32 to vector<1x8x128xf32>
      %c0_29 = arith.constant 0 : index
      %c0_30 = arith.constant 0 : index
      %c0_31 = arith.constant 0 : index
      %73 = vector.load %arg5[%c0_29, %c0_30, %c0_31] : memref<1x8x128xf32, #tpu.memory_space<vmem>>, vector<1x8x128xf32>
      tpu.vector_store %arg5[%c0_29, %c0_30, %c0_31], %72 {strides = array<i32>} : memref<1x8x128xf32, #tpu.memory_space<vmem>>, vector<1x8x128xf32>,
    } else {
    }
    %59 = tpu.iota {dimensions = array<i32: 1>} : vector<1x8x128xi32>
    %60 = tpu.iota {dimensions = array<i32: 2>} : vector<1x8x128xi32>
    %c0_19 = arith.constant 0 : index
    %c0_20 = arith.constant 0 : index
    %c0_21 = arith.constant 0 : index
    %61 = vector.load %arg5[%c0_19, %c0_20, %c0_21] : memref<1x8x128xf32, #tpu.memory_space<vmem>>, vector<1x8x128xf32>
    %c0_i32_22 = arith.constant 0 : i32
    %62 = vector.broadcast %c0_i32_22 : i32 to vector<1x8x128xi32>
    %63 = arith.cmpi eq, %59, %62 : vector<1x8x128xi32>
    %c0_i32_23 = arith.constant 0 : i32
    %64 = vector.broadcast %c0_i32_23 : i32 to vector<1x8x128xi32>
    %65 = arith.cmpi eq, %60, %64 : vector<1x8x128xi32>
    %66 = arith.andi %63, %65 : vector<1x8x128xi1>
    %cst_24 = arith.constant 0.000000e+00 : f32
    %67 = vector.broadcast %55 : f32 to vector<1x8x128xf32>
    %68 = vector.broadcast %cst_24 : f32 to vector<1x8x128xf32>
    %69 = arith.select %66, %67, %68 : vector<1x8x128xi1>, vector<1x8x128xf32>
    %70 = arith.addf %61, %69 : vector<1x8x128xf32>
    %c0_25 = arith.constant 0 : index
    %c0_26 = arith.constant 0 : index
    %c0_27 = arith.constant 0 : index
    %71 = vector.load %arg5[%c0_25, %c0_26, %c0_27] : memref<1x8x128xf32, #tpu.memory_space<vmem>>, vector<1x8x128xf32>
    tpu.vector_store %arg5[%c0_25, %c0_26, %c0_27], %70 {strides = array<i32>} : memref<1x8x128xf32, #tpu.memory_space<vmem>>, vector<1x8x128xf32>,
    return
  }
  func.func @transform_0(%arg0: i32, %arg1: i32) -> (i32, i32) {
    %c1_i32 = arith.constant 1 : i32
    %0 = arith.muli %arg0, %c1_i32 : i32
    %1 = arith.addi %0, %arg1 : i32
    %c0_i32 = arith.constant 0 : i32
    %c0_i32_0 = arith.constant 0 : i32
    return %1, %c0_i32 : i32, i32
  }
  func.func @transform_1(%arg0: i32, %arg1: i32) -> (i32, i32) {
    %c1_i32 = arith.constant 1 : i32
    %0 = arith.muli %arg0, %c1_i32 : i32
    %1 = arith.addi %0, %arg1 : i32
    %c0_i32 = arith.constant 0 : i32
    %c0_i32_0 = arith.constant 0 : i32
    return %1, %c0_i32 : i32, i32
  }
  func.func @transform_2(%arg0: i32, %arg1: i32) -> (i32, i32) {
    %c1_i32 = arith.constant 1 : i32
    %0 = arith.muli %arg0, %c1_i32 : i32
    %1 = arith.addi %0, %arg1 : i32
    %c0_i32 = arith.constant 0 : i32
    %c0_i32_0 = arith.constant 0 : i32
    return %1, %c0_i32 : i32, i32
  }
  func.func @transform_3(%arg0: i32, %arg1: i32) -> (i32, i32, i32) {
    %c0_i32 = arith.constant 0 : i32
    %c0_i32_0 = arith.constant 0 : i32
    %c0_i32_1 = arith.constant 0 : i32
    return %arg0, %c0_i32, %c0_i32_0 : i32, i32, i32
  }
}

</mosaic_0001>

<bundles_post_ra>
// kernel: tpu_custom_call.1
= control target key start
LH: loop header
LB: loop body
LE: loop exit
PB: predicated region body
PF: predicated region fallthrough
CT: control target
= control target key end

     0   :  { %8 = vsyncpa [#allocation3], 0  ;;  %s375_s0 = inlined_call_operand.hbm [shape: f32[8,32], index: 0, kind: input, shape index: {}]   ;;  %s376_s1 = inlined_call_operand.hbm [shape: f32[8,32], index: 1, kind: input, shape index: {}]   ;;  %s377_s2 = inlined_call_operand.hbm [shape: f32[8,32], index: 2, kind: input, shape index: {}]   ;;  %s378_s3 = inlined_call_operand.hbm [shape: f32[1,8,128], index: 3, kind: output, shape index: {}]  }
   0x1   :  { %9 = vsyncpa [#allocation6], 0 }
   0x2   :  { %10 = vsyncpa [#allocation4], 0  ;;  %s298_s12 = smov [#allocation5]   ;;  %s299_s14 = smov [#allocation2]  }
   0x3   :  { %s33_s13 = sshll.u32 %s298_s12, 4  ;;  %s20_s15 = sshll.u32 %s299_s14, 4  ;;  %s34_s13 = int_to_ptr.vmem [resolvable:$true] %s33_s13  ;;  %s21_s15 = int_to_ptr.vmem [resolvable:$true] %s20_s15 }
   0x4   :  { %s204_s18 = scalar_lea.hbm %s376_s1, 128 }
   0x5   :  { %p205_p0 = scmp.ne.s32.totalorder %s376_s1, %s204_s18  ;;  %p208_p1 = scmp.lt.u32.totalorder %s204_s18, %s376_s1 }
   0x7   :  { %p210_p2 = pnand %p208_p1, %p205_p0 }
   0x9   :  { %213 = shalt.err (!%p210_p2)
}
   0xa   :  { %s214_s23 = scalar_lea.vmem %s34_s13, 128  ;;  %p219_p4 = scmp.lt.s32.totalorder %s34_s13, %s34_s13 }
   0xb   :  { %p215_p3 = scmp.ne.s32.totalorder %s34_s13, %s214_s23  ;;  %p220_p5 = scmp.lt.s32.totalorder %s214_s23, %s214_s23 }
   0xd   :  { %p221_p6 = por %p220_p5, %p219_p4 }
   0xf   :  { %p222_p7 = pnand %p221_p6, %p215_p3 }
  0x11   :  { %225 = shalt.err (!%p222_p7)
}
  0x12   :  { %36 = dma.hbm_to_vmem [thread:$0]  %s376_s1, 128, %s34_s13, [#allocation6]  }
  0x13   :  { %s226_s28 = scalar_lea.hbm %s375_s0, 128 }
  0x14   :  { %p227_p8 = scmp.ne.s32.totalorder %s375_s0, %s226_s28  ;;  %p230_p9 = scmp.lt.u32.totalorder %s226_s28, %s375_s0 }
  0x16   :  { %p232_p10 = pnand %p230_p9, %p227_p8 }
  0x18   :  { %235 = shalt.err (!%p232_p10)
}
  0x19   :  { %s236_s6 = scalar_lea.vmem %s21_s15, 128  ;;  %p241_p12 = scmp.lt.s32.totalorder %s21_s15, %s21_s15 }
  0x1a   :  { %p237_p11 = scmp.ne.s32.totalorder %s21_s15, %s236_s6  ;;  %p242_p13 = scmp.lt.s32.totalorder %s236_s6, %s236_s6 }
  0x1c   :  { %p243_p0 = por %p242_p13, %p241_p12 }
  0x1e   :  { %p244_p1 = pnand %p243_p0, %p237_p11 }
  0x20   :  { %247 = shalt.err (!%p244_p1)
}
  0x21   :  { %23 = dma.hbm_to_vmem [thread:$0]  %s375_s0, 128, %s21_s15, [#allocation3]  }
  0x22   :  { %s300_s8 = smov [#allocation7]   ;;  %s248_s12 = scalar_lea.hbm %s377_s2, 128 }
  0x23   :  { %s46_s9 = sshll.u32 %s300_s8, 4  ;;  %p249_p2 = scmp.ne.s32.totalorder %s377_s2, %s248_s12  ;;  %s47_s9 = int_to_ptr.vmem [resolvable:$true] %s46_s9 }
  0x24   :  { %p252_p3 = scmp.lt.u32.totalorder %s248_s12, %s377_s2 }
  0x26   :  { %p254_p4 = pnand %p252_p3, %p249_p2 }
  0x28   :  { %257 = shalt.err (!%p254_p4)
}
  0x29   :  { %s258_s18 = scalar_lea.vmem %s47_s9, 128  ;;  %p263_p6 = scmp.lt.s32.totalorder %s47_s9, %s47_s9 }
  0x2a   :  { %p259_p5 = scmp.ne.s32.totalorder %s47_s9, %s258_s18  ;;  %p264_p7 = scmp.lt.s32.totalorder %s258_s18, %s258_s18 }
  0x2c   :  { %p265_p8 = por %p264_p7, %p263_p6 }
  0x2e   :  { %p266_p9 = pnand %p265_p8, %p259_p5 }
  0x30   :  { %269 = shalt.err (!%p266_p9)
}
  0x31   :  { %49 = dma.hbm_to_vmem [thread:$0]  %s377_s2, 128, %s47_s9, [#allocation6]  }
  0x32   :  { %292 = dma.done.wait [#allocation3], 128  }
  0x33   :  { %293 = vsyncadd [#allocation3], 4294967168 }
  0x34   :  { %294 = dma.done.wait [#allocation6], 256  }
  0x35   :  { %295 = vsyncadd [#allocation6], 4294967040  ;;  %v65_v0 = vld [vmem:[#allocation7] sm:$0xff]  ;;  %vm67_vm0 = vcmask 261120   ;;  %v63_v1 = vld [vmem:[#allocation2] sm:$0xff]  ;;  %vm141_vm8 = vcmask 7168  }
  0x36   :  { %v64_v2 = vld [vmem:[#allocation5] sm:$0xff]  ;;  %v75_v3 = vmul.f32 %v65_v0, %v65_v0  ;;  %v66_v4 = vmul.f32 %v63_v1, %v63_v1  ;;  %v83_v10 = vmul.f32 %v65_v0, %v63_v1  ;;  %s301_s19 = smov [#allocation8]  }
  0x37   :  { %v71_v5 = vmul.f32 %v64_v2, %v64_v2  ;;  %v79_v6 = vmul.f32 %v64_v2, %v63_v1  ;;  %v135_v2 = vlaneseq  ;;  %s173_s20 = sshll.u32 %s301_s19, 4  ;;  %s174_s20 = int_to_ptr.vmem [resolvable:$true] %s173_s20 }
  0x38   :  { %v76_v7 = vsel %vm67_vm0, %v75_v3, 0.0  ;;  %v68_v8 = vsel %vm67_vm0, %v66_v4, 0.0  ;;  %v84_v12 = vsel %vm67_vm0, %v83_v10, 0.0  ;;  %s270_s21 = scalar_lea.vmem %s174_s20, 128  ;;  %p275_p11 = scmp.lt.s32.totalorder %s174_s20, %s174_s20 }
  0x39   :  { %77 = vadd.xlane.f32.xlu1 %v76_v7  ;;  %69 = vadd.xlane.f32.xlu0 %v68_v8  ;;  %v72_v9 = vsel %vm67_vm0, %v71_v5, 0.0  ;;  %v80_v11 = vsel %vm67_vm0, %v79_v6, 0.0  ;;  %v136_v3 = vshrl.u32 %v135_v2, 7  ;;  %v158_v4 = vand.u32 127, %v135_v2  ;;  %p271_p10 = scmp.ne.s32.totalorder %s174_s20, %s270_s21  ;;  %p276_p12 = scmp.lt.s32.totalorder %s270_s21, %s270_s21 }
  0x3b   :  { %vm160_vm9 = vcmp.eq.s32.totalorder %v136_v3, 0  ;;  %vm161_vm10 = vcmp.eq.s32.totalorder %v158_v4, 0  ;;  %p277_p13 = por %p276_p12, %p275_p11 }
  0x3c   :  { %vm162_vm11 = vmand %vm160_vm9, %vm161_vm10 }
  0x3d   :  { %73 = vadd.xlane.f32.xlu0 %v72_v9  ;;  %81 = vadd.xlane.f32.xlu1 %v80_v11  ;;  %p278_p0 = pnand %p277_p13, %p271_p10 }
  0x41   :  { %85 = vadd.xlane.f32.xlu0 %v84_v12 }
  0xc6   :  { %v78_v13 = vpop.xlane.xlu1 %77  ;;  %v70_v14 = vpop.xlane.xlu0 %69 }
  0xc7   :  { %190 = vrsqrt.f32 %v78_v13  ;;  %vm105_vm1 = vcmp.eq.f32.partialorder %v78_v13, inf  ;;  %v108_v19 = vand.u32 2147483648, %v78_v13  ;;  %vm107_vm2 = vcmp.eq.f32.partialorder %v78_v13, 0.0 }
  0xc8   :  { %192 = vrsqrt.f32 %v70_v14  ;;  %vm89_vm3 = vcmp.eq.f32.partialorder %v70_v14, inf  ;;  %v92_v22 = vand.u32 2147483648, %v70_v14  ;;  %vm91_vm4 = vcmp.eq.f32.partialorder %v70_v14, 0.0 }
  0xca   :  { %v74_v15 = vpop.xlane.xlu0 %73  ;;  %v82_v38 = vpop.xlane.xlu1 %81 }
  0xcb   :  { %194 = vrsqrt.f32 %v74_v15  ;;  %vm97_vm5 = vcmp.eq.f32.partialorder %v74_v15, inf  ;;  %v100_v29 = vand.u32 2147483648, %v74_v15  ;;  %vm99_vm6 = vcmp.eq.f32.partialorder %v74_v15, 0.0 }
  0xce   :  { %v86_v37 = vpop.xlane.xlu0 %85 }
  0xd1   :  { %v191_v16 = vpop.eup %190 }
  0xd2   :  { %v193_v17 = vpop.eup %192  ;;  %v104_v18 = vmul.f32 %v191_v16, %v78_v13 }
  0xd3   :  { %v88_v20 = vmul.f32 %v193_v17, %v70_v14 }
  0xd4   :  { %v106_v21 = vsel %vm105_vm1, %v78_v13, %v104_v18 }
  0xd5   :  { %v195_v23 = vpop.eup %194  ;;  %v109_v24 = vsel %vm107_vm2, %v108_v19, %v106_v21  ;;  %v90_v25 = vsel %vm89_vm3, %v70_v14, %v88_v20 }
  0xd6   :  { %v93_v26 = vsel %vm91_vm4, %v92_v22, %v90_v25  ;;  %v96_v27 = vmul.f32 %v195_v23, %v74_v15  ;;  %v110_v28 = vmax.f32 %v109_v24, 1e-12 }
  0xd7   :  { %v94_v30 = vmax.f32 %v93_v26, 1e-12 }
  0xd8   :  { %v98_v31 = vsel %vm97_vm5, %v74_v15, %v96_v27 }
  0xd9   :  { %v101_v32 = vsel %vm99_vm6, %v100_v29, %v98_v31  ;;  %v114_v33 = vmul.f32 %v110_v28, %v94_v30 }
  0xda   :  { %v102_v34 = vmax.f32 %v101_v32, 1e-12 }
  0xdb   :  { %196 = vrcp.f32 %v114_v33 }
  0xdc   :  { %v111_v35 = vmul.f32 %v102_v34, %v94_v30 }
  0xde   :  { %198 = vrcp.f32 %v111_v35 }
  0xe5   :  { %v197_v36 = vpop.eup %196 }
  0xe6   :  { %v116_v40 = vmul.f32 %v197_v36, %v86_v37 }
  0xe8   :  { %v199_v39 = vpop.eup %198 }
  0xe9   :  { %v113_v41 = vmul.f32 %v199_v39, %v82_v38 }
  0xeb   :  { %v117_v42 = vsub.f32 %v116_v40, %v113_v41 }
  0xed   :  { %v118_v43 = vmul.f32 14.285714, %v117_v42 }
  0xef   :  { %v120_v44 = vand.u32 2147483647, %v118_v43  ;;  %v119_v55 = vmax.f32 %v118_v43, 0.0 }
  0xf1   :  { %v121_v45 = vsub.f32 0.0, %v120_v44 }
  0xf3   :  { %v122_v46 = vmul.f32 1.442695, %v121_v45 }
  0xf5   :  { %200 = vpow2.f32 %v122_v46 }
  0xff   :  { %v201_v47 = vpop.eup %200 }
 0x100   :  { %v124_v48 = vadd.f32 1.0, %v201_v47  ;;  %v127_v49 = vmul.f32 -0.5, %v201_v47  ;;  %v130_v51 = vand.u32 2147483647, %v201_v47 }
 0x102   :  { %202 = vlog2.f32 %v124_v48  ;;  %v128_v50 = vadd.f32 1.0, %v127_v49  ;;  %vm131_vm7 = vcmp.lt.f32.partialorder %v130_v51, 0.0004427343 }
 0x104   :  { %v129_v54 = vmul.f32 %v201_v47, %v128_v50 }
 0x10c   :  { %v203_v52 = vpop.eup %202 }
 0x10d   :  { %v126_v53 = vmul.f32 0.6931472, %v203_v52 }
 0x10f   :  { %v132_v56 = vsel %vm131_vm7, %v129_v54, %v126_v53 }
 0x110   :  { %v133_v57 = vadd.f32 %v132_v56, %v119_v55 }
 0x112   :  { %v142_v58 = vsel %vm141_vm8, %v133_v57, 0.0 }
 0x113   :  { %143 = vadd.xlane.f32.xlu1 %v142_v58 }
 0x1a0   :  { %v144_v59 = vpop.xlane.xlu1 %143 }
 0x1a1   :  { %v145_v60 = vrot.slane %v144_v59, 4 }
 0x1a3   :  { %v146_v61 = vadd.f32 %v145_v60, %v144_v59 }
 0x1a5   :  { %v147_v62 = vrot.slane %v146_v61, 2 }
 0x1a7   :  { %v148_v63 = vadd.f32 %v147_v62, %v146_v61 }
 0x1a9   :  { %v149_v0 = vrot.slane %v148_v63, 1 }
 0x1ab   :  { %v150_v1 = vadd.f32 %v149_v0, %v148_v63 }
 0x1ad   :  { %183 = vpush %v150_v1 }
 0x1de   :  { %s184_s2 = spop %183 }
 0x1df   :  { %v163_v5 = vstv %s184_s2 }
 0x1e0   :  { %v164_v6 = vsel %vm162_vm11, %v163_v5, 0.0 }
 0x1e1   :  { %166 = vst [vmem:[#allocation8] sm:$0xff] %v164_v6 }
 0x1e2   :  { %281 = shalt.err (!%p278_p0)
}
 0x1e3   :  { %s282_s24 = scalar_lea.hbm %s378_s3, 128 }
 0x1e4   :  { %p283_p1 = scmp.ne.s32.totalorder %s378_s3, %s282_s24  ;;  %p286_p2 = scmp.lt.u32.totalorder %s282_s24, %s378_s3 }
 0x1e6   :  { %p288_p3 = pnand %p286_p2, %p283_p1 }
 0x1e8   :  { %291 = shalt.err (!%p288_p3)
}
 0x1e9   :  { %176 = dma.vmem_to_hbm [thread:$0]  %s174_s20, 128, %s378_s3, [#allocation4]  }
 0x1ea   :  { %296 = dma.done.wait [#allocation4], 128  }
 0x1eb   :  { %297 = vsyncadd [#allocation4], 4294967168 }
 0x1ec   :  { %180 = vsyncpa [#allocation3], 1 }
 0x1ed   :  { %181 = vsyncpa [#allocation6], 1 }
 0x1ee   :  { %182 = vsyncpa [#allocation4], 1 }

</bundles_post_ra>
